<compile_context>
chip_gen: v7x
topology: tpu7x:2x2x1
jax: 0.10.0
libtpu: 0.0.40
codegen_flags: <defaults>
</compile_context>

<pallas_src>
import functools

import jax
import jax.numpy as jnp
from jax.experimental import pallas as pl
from jax.experimental.pallas import tpu as pltpu

LANES = 128
SUBLANES = 8
# 4096 rows * 128 lanes * 4 B (f32) = 2 MiB per input per pipeline buffer.
MAX_BLOCK_ROWS = 4096


def _mse_kernel(x_ref, y_ref, o_ref, *, rows, block_rows, steps_per_core,
                need_mask):
    c = pl.program_id(0)  # core-half (parallel axis)
    i = pl.program_id(1)  # streaming reduction step (arbitrary axis)

    # Initialize this core-half's resident (8, 128) accumulator block.
    @pl.when(i == 0)
    def _():
        o_ref[...] = jnp.zeros_like(o_ref)

    d = x_ref[...].astype(jnp.float32) - y_ref[...].astype(jnp.float32)
    sq = d * d

    if need_mask:
        # Zero rows past the real extent (partial last block and the clamped /
        # duplicated blocks of the over-covering core-half).
        base = (c * steps_per_core + i) * block_rows
        ridx = base + jax.lax.broadcasted_iota(jnp.int32, (block_rows, LANES), 0)
        sq = jnp.where(ridx < rows, sq, 0.0)

    # Fold (block_rows, 128) -> (8, 128) with elementwise VALU adds only
    # (no cross-lane traffic; the final 1024-element reduce happens once in
    # the wrapper).
    folded = jnp.sum(sq.reshape(block_rows // SUBLANES, SUBLANES, LANES), axis=0)
    o_ref[...] += folded


def self_mseloss(y_input, y_target):
    assert y_input.shape == y_target.shape, "shapes must match"
    num = int(y_input.size)  # torch.numel(y_input)
    if num == 0:
        return jnp.float32(jnp.nan)  # matches torch: sum(empty) / 0 -> nan

    xf = jnp.ravel(y_input)
    yf = jnp.ravel(y_target)

    # Pad (native dtype) only if needed so the flat data forms a (rows, 128)
    # slab with rows a multiple of 8; zero padding contributes 0 to the sum.
    tile = SUBLANES * LANES
    pad = (-num) % tile
    if pad:
        xf = jnp.pad(xf, (0, pad))
        yf = jnp.pad(yf, (0, pad))

    rows = (num + pad) // LANES
    x2 = xf.reshape(rows, LANES)
    y2 = yf.reshape(rows, LANES)

    block_rows = min(MAX_BLOCK_ROWS, rows)       # always a multiple of 8
    steps = int(pl.cdiv(rows, block_rows))       # total streaming blocks
    ncores = 2 if steps >= 2 else 1              # don't spawn an all-masked half
    spc = int(pl.cdiv(steps, ncores))            # streaming steps per core-half
    need_mask = (ncores * spc * block_rows) != rows

    def in_map(c, i):
        # Clamp so the DMA never targets a block start past the array; the
        # over-covered contribution is zeroed by the in-kernel row mask.
        return (jnp.minimum(c * spc + i, steps - 1), 0)

    kernel = functools.partial(
        _mse_kernel,
        rows=rows,
        block_rows=block_rows,
        steps_per_core=spc,
        need_mask=need_mask,
    )

    itemsize = jnp.dtype(y_input.dtype).itemsize
    partials = pl.pallas_call(
        kernel,
        out_shape=jax.ShapeDtypeStruct((ncores * SUBLANES, LANES), jnp.float32),
        grid_spec=pltpu.PrefetchScalarGridSpec(
            num_scalar_prefetch=0,
            grid=(ncores, spc),
            in_specs=[
                pl.BlockSpec((block_rows, LANES), in_map),
                pl.BlockSpec((block_rows, LANES), in_map),
            ],
            out_specs=pl.BlockSpec((SUBLANES, LANES), lambda c, i: (c, 0)),
        ),
        compiler_params=pltpu.CompilerParams(
            dimension_semantics=("parallel", "arbitrary")),
        cost_estimate=pl.CostEstimate(
            flops=3 * num,
            bytes_accessed=2 * num * itemsize + ncores * SUBLANES * LANES * 4,
            transcendentals=0),
    )(x2, y2)

    # Tiny final reduction over the ncores * 8 * 128 partial sums, divided by
    # the ORIGINAL (unpadded) element count.
    return jnp.sum(partials) / num


if __name__ == "__main__":
    key = jax.random.PRNGKey(0)
    k1, k2, k3, k4 = jax.random.split(key, 4)

    # Small NCHW-shaped example inputs (module is shape-agnostic).
    x_shape = (2, 4, 16, 16)
    y_input = jax.random.normal(k1, x_shape, dtype=jnp.float32)
    y_target = jax.random.normal(k2, x_shape, dtype=jnp.float32)

    loss = self_mseloss(y_input, y_target)
    loss = jax.block_until_ready(loss)

    # Reference check (plain JAX).
    ref = jnp.sum((y_input - y_target) ** 2) / y_input.size
    assert jnp.allclose(loss, ref, rtol=1e-5, atol=1e-6), (loss, ref)

    # Odd-sized input exercises the pad + row-mask path.
    z_shape = (3, 5, 7, 11)
    a = jax.random.normal(k3, z_shape, dtype=jnp.float32)
    b = jax.random.normal(k4, z_shape, dtype=jnp.float32)
    loss2 = jax.block_until_ready(self_mseloss(a, b))
    ref2 = jnp.sum((a - b) ** 2) / a.size
    assert jnp.allclose(loss2, ref2, rtol=1e-5, atol=1e-6), (loss2, ref2)

    # bf16 inputs exercise the in-kernel f32 upcast path.
    c_ = a.astype(jnp.bfloat16)
    d_ = b.astype(jnp.bfloat16)
    loss3 = jax.block_until_ready(self_mseloss(c_, d_))
    ref3 = jnp.sum((c_.astype(jnp.float32) - d_.astype(jnp.float32)) ** 2) / c_.size
    assert jnp.allclose(loss3, ref3, rtol=1e-3, atol=1e-3), (loss3, ref3)

    print("KERNEL_OK")
</pallas_src>

<mosaic_0001>
module attributes {stable_mosaic.version = 11 : i64} {
  func.func @_mse_kernel(%arg0: i32, %arg1: i32, %arg2: memref<16x128xf32, #tpu.memory_space<vmem>>, %arg3: memref<16x128xf32, #tpu.memory_space<vmem>>, %arg4: memref<8x128xf32, #tpu.memory_space<vmem>>) attributes {dimension_semantics = [#tpu.dimension_semantics<parallel>, #tpu.dimension_semantics<arbitrary>], iteration_bounds = array<i64: 1, 1>, scalar_prefetch = 0 : i64, scratch_operands = 0 : i64, tpu.core_type = #tpu.core_type<tc>, window_params = [{transform_indices = @transform_0, window_bounds = array<i64: 16, 128>}, {transform_indices = @transform_1, window_bounds = array<i64: 16, 128>}, {transform_indices = @transform_2, window_bounds = array<i64: 8, 128>}]} {
    %c0_i32 = arith.constant 0 : i32
    %0 = arith.cmpi eq, %arg1, %c0_i32 : i32
    %1 = arith.extui %0 : i1 to i32
    %c0_i32_0 = arith.constant 0 : i32
    %2 = arith.cmpi ne, %1, %c0_i32_0 : i32
    scf.if %2 {
      %cst_8 = arith.constant 0.000000e+00 : f32
      %12 = vector.broadcast %cst_8 : f32 to vector<8x128xf32>
      %c0_9 = arith.constant 0 : index
      %c0_10 = arith.constant 0 : index
      %13 = vector.load %arg4[%c0_9, %c0_10] : memref<8x128xf32, #tpu.memory_space<vmem>>, vector<8x128xf32>
      tpu.vector_store %arg4[%c0_9, %c0_10], %12 {strides = array<i32>} : memref<8x128xf32, #tpu.memory_space<vmem>>, vector<8x128xf32>,
    } else {
    }
    %c0 = arith.constant 0 : index
    %c0_1 = arith.constant 0 : index
    %3 = vector.load %arg2[%c0, %c0_1] : memref<16x128xf32, #tpu.memory_space<vmem>>, vector<16x128xf32>
    %c0_2 = arith.constant 0 : index
    %c0_3 = arith.constant 0 : index
    %4 = vector.load %arg3[%c0_2, %c0_3] : memref<16x128xf32, #tpu.memory_space<vmem>>, vector<16x128xf32>
    %5 = arith.subf %3, %4 : vector<16x128xf32>
    %6 = arith.mulf %5, %5 : vector<16x128xf32>
    %7 = vector.shape_cast %6 : vector<16x128xf32> to vector<2x8x128xf32>
    %cst = arith.constant dense<0.000000e+00> : vector<8x128xf32>
    %8 = vector.multi_reduction <add>, %7, %cst [0] : vector<2x8x128xf32> to vector<8x128xf32>
    %c0_4 = arith.constant 0 : index
    %c0_5 = arith.constant 0 : index
    %9 = vector.load %arg4[%c0_4, %c0_5] : memref<8x128xf32, #tpu.memory_space<vmem>>, vector<8x128xf32>
    %10 = arith.addf %9, %8 : vector<8x128xf32>
    %c0_6 = arith.constant 0 : index
    %c0_7 = arith.constant 0 : index
    %11 = vector.load %arg4[%c0_6, %c0_7] : memref<8x128xf32, #tpu.memory_space<vmem>>, vector<8x128xf32>
    tpu.vector_store %arg4[%c0_6, %c0_7], %10 {strides = array<i32>} : memref<8x128xf32, #tpu.memory_space<vmem>>, vector<8x128xf32>,
    return
  }
  func.func @transform_0(%arg0: i32, %arg1: i32) -> (i32, i32) {
    %c1_i32 = arith.constant 1 : i32
    %0 = arith.muli %arg0, %c1_i32 : i32
    %1 = arith.addi %0, %arg1 : i32
    %c0_i32 = arith.constant 0 : i32
    %2 = arith.minsi %1, %c0_i32 : i32
    %c0_i32_0 = arith.constant 0 : i32
    %c0_i32_1 = arith.constant 0 : i32
    return %2, %c0_i32_0 : i32, i32
  }
  func.func @transform_1(%arg0: i32, %arg1: i32) -> (i32, i32) {
    %c1_i32 = arith.constant 1 : i32
    %0 = arith.muli %arg0, %c1_i32 : i32
    %1 = arith.addi %0, %arg1 : i32
    %c0_i32 = arith.constant 0 : i32
    %2 = arith.minsi %1, %c0_i32 : i32
    %c0_i32_0 = arith.constant 0 : i32
    %c0_i32_1 = arith.constant 0 : i32
    return %2, %c0_i32_0 : i32, i32
  }
  func.func @transform_2(%arg0: i32, %arg1: i32) -> (i32, i32) {
    %c0_i32 = arith.constant 0 : i32
    %c0_i32_0 = arith.constant 0 : i32
    return %arg0, %c0_i32 : i32, i32
  }
}

</mosaic_0001>

<bundles_post_ra>
// kernel: tpu_custom_call.1
= control target key start
LH: loop header
LB: loop body
LE: loop exit
PB: predicated region body
PF: predicated region fallthrough
CT: control target
= control target key end

     0   :  { %7 = vsyncpa [#allocation3], 0  ;;  %s231_s0 = inlined_call_operand.hbm [shape: f32[16,128], index: 0, kind: input, shape index: {}]   ;;  %s232_s1 = inlined_call_operand.hbm [shape: f32[16,128], index: 1, kind: input, shape index: {}]   ;;  %s233_s2 = inlined_call_operand.hbm [shape: f32[8,128], index: 2, kind: output, shape index: {}]  }
   0x1   :  { %8 = vsyncpa [#allocation6], 0 }
   0x2   :  { %9 = vsyncpa [#allocation4], 0  ;;  %s175_s9 = smov [#allocation2]   ;;  %s103_s13 = scalar_lea.hbm %s231_s0, 256 }
   0x3   :  { %s21_s10 = sshll.u32 %s175_s9, 4  ;;  %p104_p0 = scmp.ne.s32.totalorder %s231_s0, %s103_s13  ;;  %s22_s10 = int_to_ptr.vmem [resolvable:$true] %s21_s10 }
   0x4   :  { %p107_p1 = scmp.lt.u32.totalorder %s103_s13, %s231_s0 }
   0x6   :  { %p109_p2 = pnand %p107_p1, %p104_p0 }
   0x8   :  { %112 = shalt.err (!%p109_p2)
}
   0x9   :  { %s113_s18 = scalar_lea.vmem %s22_s10, 256  ;;  %p118_p4 = scmp.lt.s32.totalorder %s22_s10, %s22_s10 }
   0xa   :  { %p114_p3 = scmp.ne.s32.totalorder %s22_s10, %s113_s18  ;;  %p119_p5 = scmp.lt.s32.totalorder %s113_s18, %s113_s18 }
   0xc   :  { %p120_p6 = por %p119_p5, %p118_p4 }
   0xe   :  { %p121_p7 = pnand %p120_p6, %p114_p3 }
  0x10   :  { %124 = shalt.err (!%p121_p7)
}
  0x11   :  { %s176_s19 = smov 128   ;;  %s177_s20 = smov 8  }
  0x12   :  { %27 = dma.hbm_to_vmem [thread:$0]  %s231_s0, 256, %s22_s10, [#allocation3], %s176_s19, %s176_s19, %s177_s20  }
  0x13   :  { %s178_s23 = smov [#allocation5]   ;;  %s125_s27 = scalar_lea.hbm %s232_s1, 256 }
  0x14   :  { %s39_s24 = sshll.u32 %s178_s23, 4  ;;  %p126_p8 = scmp.ne.s32.totalorder %s232_s1, %s125_s27  ;;  %s40_s24 = int_to_ptr.vmem [resolvable:$true] %s39_s24 }
  0x15   :  { %p129_p9 = scmp.lt.u32.totalorder %s125_s27, %s232_s1 }
  0x17   :  { %p131_p10 = pnand %p129_p9, %p126_p8 }
  0x19   :  { %134 = shalt.err (!%p131_p10)
}
  0x1a   :  { %s135_s4 = scalar_lea.vmem %s40_s24, 256  ;;  %p140_p12 = scmp.lt.s32.totalorder %s40_s24, %s40_s24 }
  0x1b   :  { %p136_p11 = scmp.ne.s32.totalorder %s40_s24, %s135_s4  ;;  %p141_p13 = scmp.lt.s32.totalorder %s135_s4, %s135_s4 }
  0x1d   :  { %p142_p0 = por %p141_p13, %p140_p12 }
  0x1f   :  { %p143_p1 = pnand %p142_p0, %p136_p11 }
  0x21   :  { %146 = shalt.err (!%p143_p1)
}
  0x22   :  { %45 = dma.hbm_to_vmem [thread:$0]  %s232_s1, 256, %s40_s24, [#allocation6], %s176_s19, %s176_s19, %s177_s20  }
  0x23   :  { %169 = dma.done.wait [#allocation3], 256  }
  0x24   :  { %170 = vsyncadd [#allocation3], 4294967040 }
  0x25   :  { %171 = dma.done.wait [#allocation6], 256  }
  0x26   :  { %172 = vsyncadd [#allocation6], 4294967040  ;;  %v65_v0 = vld [vmem:[#allocation2] sm:$0xff]  ;;  %v66_v1 = vld [vmem:[#allocation2 + $0x8] sm:$0xff]  ;;  %s179_s6 = smov [#allocation7]  }
  0x27   :  { %v67_v2 = vld [vmem:[#allocation5] sm:$0xff]  ;;  %v68_v3 = vld [vmem:[#allocation5 + $0x8] sm:$0xff]  ;;  %s83_s7 = sshll.u32 %s179_s6, 4  ;;  %s84_s7 = int_to_ptr.vmem [resolvable:$true] %s83_s7 }
  0x28   :  { %v69_v4 = vsub.f32 %v65_v0, %v67_v2  ;;  %v70_v5 = vsub.f32 %v66_v1, %v68_v3  ;;  %s147_s8 = scalar_lea.vmem %s84_s7, 128  ;;  %p152_p3 = scmp.lt.s32.totalorder %s84_s7, %s84_s7 }
  0x29   :  { %p148_p2 = scmp.ne.s32.totalorder %s84_s7, %s147_s8  ;;  %p153_p4 = scmp.lt.s32.totalorder %s147_s8, %s147_s8 }
  0x2a   :  { %v71_v6 = vmul.f32 %v69_v4, %v69_v4  ;;  %v72_v7 = vmul.f32 %v70_v5, %v70_v5 }
  0x2b   :  { %p154_p5 = por %p153_p4, %p152_p3 }
  0x2c   :  { %v73_v8 = vadd.f32 %v72_v7, %v71_v6 }
  0x2d   :  { %p155_p6 = pnand %p154_p5, %p148_p2 }
  0x2e   :  { %76 = vst [vmem:[#allocation7] sm:$0xff] %v73_v8 }
  0x2f   :  { %158 = shalt.err (!%p155_p6)
}
  0x30   :  { %s159_s10 = scalar_lea.hbm %s233_s2, 128 }
  0x31   :  { %p160_p7 = scmp.ne.s32.totalorder %s233_s2, %s159_s10  ;;  %p163_p8 = scmp.lt.u32.totalorder %s159_s10, %s233_s2 }
  0x33   :  { %p165_p9 = pnand %p163_p8, %p160_p7 }
  0x35   :  { %168 = shalt.err (!%p165_p9)
}
  0x36   :  { %86 = dma.vmem_to_hbm [thread:$0]  %s84_s7, 128, %s233_s2, [#allocation4]  }
  0x37   :  { %173 = dma.done.wait [#allocation4], 128  }
  0x38   :  { %174 = vsyncadd [#allocation4], 4294967168 }
  0x39   :  { %90 = vsyncpa [#allocation3], 1 }
  0x3a   :  { %91 = vsyncpa [#allocation6], 1 }
  0x3b   :  { %92 = vsyncpa [#allocation4], 1 }

</bundles_post_ra>
